<compile_context>
chip_gen: v7x
topology: tpu7x:2x2x1
jax: 0.10.0
libtpu: 0.0.40
codegen_flags: <defaults>
</compile_context>

<pallas_src>
import functools

import jax
import jax.numpy as jnp
from jax.experimental import pallas as pl
from jax.experimental.pallas import tpu as pltpu

ENV_PARAMS = {'obs': 3, 'goal': 3, 'action': 3, 'action_max': 0.2}

IN_DIM = ENV_PARAMS['obs'] + ENV_PARAMS['goal']   # 6
H1 = 36
H2 = 81
OUT_DIM = ENV_PARAMS['action']                    # 3

LANES = 128                     # padded feature width for every layer
PARAM_ROWS = 3 * LANES + 8      # w1(128) | w2(128) | w3(128) | biases(8)  -> 392 rows
MAX_TB = 1024                   # max batch-tile rows (512 KB/block f32)


# ---------------------------------------------------------------------------
# Kernel
# ---------------------------------------------------------------------------
def anet_kernel(x_ref, p_ref, o_ref):
    # x_ref : (TB, 128)  f32, columns >= IN_DIM are zero
    # p_ref : (392, 128) f32 packed parameter slab (resident in VMEM)
    # o_ref : (TB, 128)  f32, columns >= OUT_DIM come out exactly zero
    x = x_ref[...]

    w1 = p_ref[pl.ds(0 * LANES, LANES), :]          # (128, 128)
    w2 = p_ref[pl.ds(1 * LANES, LANES), :]          # (128, 128)
    w3 = p_ref[pl.ds(2 * LANES, LANES), :]          # (128, 128)
    bias_blk = p_ref[pl.ds(3 * LANES, 8), :]        # (8, 128); rows 0/1/2 = b1/b2/b3
    b1 = bias_blk[0:1, :]
    b2 = bias_blk[1:2, :]
    b3 = bias_blk[2:3, :]

    # MXU matmuls with f32 accumulation; bias add + ReLU ride the VPU (free filler).
    h1 = jnp.dot(x, w1, preferred_element_type=jnp.float32) + b1
    h1 = jnp.maximum(h1, 0.0)
    h2 = jnp.dot(h1, w2, preferred_element_type=jnp.float32) + b2
    h2 = jnp.maximum(h2, 0.0)
    out = jnp.dot(h2, w3, preferred_element_type=jnp.float32) + b3

    o_ref[...] = out.astype(o_ref.dtype)            # lane-dense (TB, 128) store


# ---------------------------------------------------------------------------
# Host-side parameter packing (done once, outside the kernel)
# ---------------------------------------------------------------------------
def pack_params(params):
    """Pack w1,b1,w2,b2,w3,b3 into one zero-padded (392, 128) f32 slab."""
    def pad_w(w):
        out = jnp.zeros((LANES, LANES), jnp.float32)
        return out.at[:w.shape[0], :w.shape[1]].set(w.astype(jnp.float32))

    def pad_b(b):
        flat = jnp.reshape(b, (-1,)).astype(jnp.float32)
        return jnp.zeros((LANES,), jnp.float32).at[:flat.shape[0]].set(flat)

    bias_blk = jnp.zeros((8, LANES), jnp.float32)
    bias_blk = bias_blk.at[0].set(pad_b(params['b1']))
    bias_blk = bias_blk.at[1].set(pad_b(params['b2']))
    bias_blk = bias_blk.at[2].set(pad_b(params['b3']))

    return jnp.concatenate(
        [pad_w(params['w1']), pad_w(params['w2']), pad_w(params['w3']), bias_blk],
        axis=0)                                           # (392, 128)


# ---------------------------------------------------------------------------
# Wrapper
# ---------------------------------------------------------------------------
@functools.partial(jax.jit, static_argnames=('tb',))
def anet_forward(x, packed_params, tb=None):
    """x: (B, 6) float32. packed_params: (392, 128) f32 from pack_params()."""
    B = x.shape[0]
    if tb is None:
        # 8-aligned batch tile, capped so double buffering stays cheap even
        # within v7x's smaller (64 MiB) VMEM.
        tb = min(MAX_TB, ((B + 7) // 8) * 8)
    n_tiles = pl.cdiv(B, tb)
    b_pad = n_tiles * tb

    # Pad batch to a multiple of tb and features to 128 lanes (zeros).
    x_pad = jnp.zeros((b_pad, LANES), jnp.float32).at[:B, :IN_DIM].set(
        x.astype(jnp.float32))

    flops = 2 * b_pad * LANES * LANES * 3 + 5 * b_pad * LANES   # 3 matmuls + bias/relu
    bytes_accessed = 4 * (b_pad * LANES * 2 + PARAM_ROWS * LANES)

    out_padded = pl.pallas_call(
        anet_kernel,
        out_shape=jax.ShapeDtypeStruct((b_pad, LANES), jnp.float32),
        grid=(n_tiles,),
        in_specs=[
            pl.BlockSpec((tb, LANES), lambda i: (i, 0)),          # x tile, pipelined
            pl.BlockSpec((PARAM_ROWS, LANES), lambda i: (0, 0)),  # params, resident
        ],
        out_specs=pl.BlockSpec((tb, LANES), lambda i: (i, 0)),    # lane-dense store
        compiler_params=pltpu.CompilerParams(
            dimension_semantics=("parallel",)),
        cost_estimate=pl.CostEstimate(
            flops=flops, transcendentals=0, bytes_accessed=bytes_accessed),
    )(x_pad, packed_params)

    return out_padded[:B, :OUT_DIM]


# ---------------------------------------------------------------------------
# Init + reference
# ---------------------------------------------------------------------------
def init_params(key):
    """PyTorch nn.Linear default init: U(-1/sqrt(fan_in), 1/sqrt(fan_in))."""
    keys = jax.random.split(key, 6)

    def lin(kw, kb, fan_in, fan_out):
        bound = 1.0 / jnp.sqrt(jnp.float32(fan_in))
        w = jax.random.uniform(kw, (fan_in, fan_out), jnp.float32, -bound, bound)
        b = jax.random.uniform(kb, (1, fan_out), jnp.float32, -bound, bound)
        return w, b

    w1, b1 = lin(keys[0], keys[1], IN_DIM, H1)
    w2, b2 = lin(keys[2], keys[3], H1, H2)
    w3, b3 = lin(keys[4], keys[5], H2, OUT_DIM)
    return {'w1': w1, 'b1': b1, 'w2': w2, 'b2': b2, 'w3': w3, 'b3': b3}


def anet_reference(x, params):
    h1 = jnp.maximum(x @ params['w1'] + params['b1'], 0.0)
    h2 = jnp.maximum(h1 @ params['w2'] + params['b2'], 0.0)
    return h2 @ params['w3'] + params['b3']


# ---------------------------------------------------------------------------
# Main
# ---------------------------------------------------------------------------
if __name__ == "__main__":
    key = jax.random.PRNGKey(0)
    k_param, k_x1, k_x2, k_x3 = jax.random.split(key, 4)

    params = init_params(k_param)
    packed = pack_params(params)

    # Small batch (single tile path).
    B1 = 8
    x1 = jax.random.normal(k_x1, (B1, IN_DIM), jnp.float32)
    out1 = jax.block_until_ready(anet_forward(x1, packed))
    ref1 = anet_reference(x1, params)
    assert out1.shape == (B1, OUT_DIM)
    assert jnp.allclose(out1, ref1, atol=1e-5, rtol=1e-5), "mismatch vs reference (B=8)"

    # Non-multiple-of-8 batch (exercises batch padding).
    B2 = 3
    x2 = jax.random.normal(k_x2, (B2, IN_DIM), jnp.float32)
    out2 = jax.block_until_ready(anet_forward(x2, packed))
    ref2 = anet_reference(x2, params)
    assert out2.shape == (B2, OUT_DIM)
    assert jnp.allclose(out2, ref2, atol=1e-5, rtol=1e-5), "mismatch vs reference (B=3)"

    # Ragged / multi-tile batch (exercises grid + pipelining path).
    B3 = 2500
    x3 = jax.random.normal(k_x3, (B3, IN_DIM), jnp.float32)
    out3 = jax.block_until_ready(anet_forward(x3, packed))
    ref3 = anet_reference(x3, params)
    assert out3.shape == (B3, OUT_DIM)
    assert jnp.allclose(out3, ref3, atol=1e-5, rtol=1e-5), "mismatch vs reference (B=2500)"

    print("KERNEL_OK")
</pallas_src>

<mosaic_0001>
module attributes {stable_mosaic.version = 11 : i64} {
  func.func @anet_kernel(%arg0: i32, %arg1: memref<8x128xf32, #tpu.memory_space<vmem>>, %arg2: memref<392x128xf32, #tpu.memory_space<vmem>>, %arg3: memref<8x128xf32, #tpu.memory_space<vmem>>) attributes {dimension_semantics = [#tpu.dimension_semantics<parallel>], iteration_bounds = array<i64: 1>, scalar_prefetch = 0 : i64, scratch_operands = 0 : i64, tpu.core_type = #tpu.core_type<tc>, window_params = [{transform_indices = @transform_0, window_bounds = array<i64: 8, 128>}, {pipeline_mode = #tpu.pipeline_mode<synchronous>, transform_indices = @transform_1, window_bounds = array<i64: 392, 128>}, {transform_indices = @transform_2, window_bounds = array<i64: 8, 128>}]} {
    %c0 = arith.constant 0 : index
    %c0_0 = arith.constant 0 : index
    %0 = vector.load %arg1[%c0, %c0_0] : memref<8x128xf32, #tpu.memory_space<vmem>>, vector<8x128xf32>
    %c0_1 = arith.constant 0 : index
    %c0_2 = arith.constant 0 : index
    %1 = vector.load %arg2[%c0_1, %c0_2] : memref<392x128xf32, #tpu.memory_space<vmem>>, vector<128x128xf32>
    %c128 = arith.constant 128 : index
    %c0_3 = arith.constant 0 : index
    %2 = vector.load %arg2[%c128, %c0_3] : memref<392x128xf32, #tpu.memory_space<vmem>>, vector<128x128xf32>
    %c256 = arith.constant 256 : index
    %c0_4 = arith.constant 0 : index
    %3 = vector.load %arg2[%c256, %c0_4] : memref<392x128xf32, #tpu.memory_space<vmem>>, vector<128x128xf32>
    %c384 = arith.constant 384 : index
    %c0_5 = arith.constant 0 : index
    %4 = vector.load %arg2[%c384, %c0_5] : memref<392x128xf32, #tpu.memory_space<vmem>>, vector<8x128xf32>
    %5 = vector.extract_strided_slice %4 {offsets = [0, 0], sizes = [1, 128], strides = [1, 1]} : vector<8x128xf32> to vector<1x128xf32>
    %6 = vector.extract_strided_slice %4 {offsets = [1, 0], sizes = [1, 128], strides = [1, 1]} : vector<8x128xf32> to vector<1x128xf32>
    %7 = vector.extract_strided_slice %4 {offsets = [2, 0], sizes = [1, 128], strides = [1, 1]} : vector<8x128xf32> to vector<1x128xf32>
    %cst = arith.constant dense<0.000000e+00> : vector<8x128xf32>
    %8 = tpu.matmul %0, %1, %cst {dimension_numbers = #tpu.dot_dimension_numbers<[1], [0], [0], [1], [0, 0, 1, 1], [], []>} : vector<8x128xf32>, vector<128x128xf32>, vector<8x128xf32> -> vector<8x128xf32>
    %9 = vector.broadcast %5 : vector<1x128xf32> to vector<8x128xf32>
    %10 = arith.addf %8, %9 : vector<8x128xf32>
    %cst_6 = arith.constant 0.000000e+00 : f32
    %11 = vector.broadcast %cst_6 : f32 to vector<8x128xf32>
    %12 = arith.maximumf %10, %11 : vector<8x128xf32>
    %cst_7 = arith.constant dense<0.000000e+00> : vector<8x128xf32>
    %13 = tpu.matmul %12, %2, %cst_7 {dimension_numbers = #tpu.dot_dimension_numbers<[1], [0], [0], [1], [0, 0, 1, 1], [], []>} : vector<8x128xf32>, vector<128x128xf32>, vector<8x128xf32> -> vector<8x128xf32>
    %14 = vector.broadcast %6 : vector<1x128xf32> to vector<8x128xf32>
    %15 = arith.addf %13, %14 : vector<8x128xf32>
    %cst_8 = arith.constant 0.000000e+00 : f32
    %16 = vector.broadcast %cst_8 : f32 to vector<8x128xf32>
    %17 = arith.maximumf %15, %16 : vector<8x128xf32>
    %cst_9 = arith.constant dense<0.000000e+00> : vector<8x128xf32>
    %18 = tpu.matmul %17, %3, %cst_9 {dimension_numbers = #tpu.dot_dimension_numbers<[1], [0], [0], [1], [0, 0, 1, 1], [], []>} : vector<8x128xf32>, vector<128x128xf32>, vector<8x128xf32> -> vector<8x128xf32>
    %19 = vector.broadcast %7 : vector<1x128xf32> to vector<8x128xf32>
    %20 = arith.addf %18, %19 : vector<8x128xf32>
    %c0_10 = arith.constant 0 : index
    %c0_11 = arith.constant 0 : index
    %21 = vector.load %arg3[%c0_10, %c0_11] : memref<8x128xf32, #tpu.memory_space<vmem>>, vector<8x128xf32>
    tpu.vector_store %arg3[%c0_10, %c0_11], %20 {strides = array<i32>} : memref<8x128xf32, #tpu.memory_space<vmem>>, vector<8x128xf32>,
    return
  }
  func.func @transform_0(%arg0: i32) -> (i32, i32) {
    %c0_i32 = arith.constant 0 : i32
    %c0_i32_0 = arith.constant 0 : i32
    return %arg0, %c0_i32 : i32, i32
  }
  func.func @transform_1(%arg0: i32) -> (i32, i32) {
    %c0_i32 = arith.constant 0 : i32
    %c0_i32_0 = arith.constant 0 : i32
    %c0_i32_1 = arith.constant 0 : i32
    return %c0_i32, %c0_i32_0 : i32, i32
  }
  func.func @transform_2(%arg0: i32) -> (i32, i32) {
    %c0_i32 = arith.constant 0 : i32
    %c0_i32_0 = arith.constant 0 : i32
    return %arg0, %c0_i32 : i32, i32
  }
}

</mosaic_0001>

<bundles_post_ra>
// kernel: anet_forward.1
= control target key start
LH: loop header
LB: loop body
LE: loop exit
PB: predicated region body
PF: predicated region fallthrough
CT: control target
= control target key end

     0   :  { %7 = vsyncpa [#allocation3], 0  ;;  %s563_s9 = smov [#allocation2]   ;;  %s632_s0 = inlined_call_operand.vmem [shape: f32[8,128], index: 0, kind: input, shape index: {}]   ;;  %s633_s1 = inlined_call_operand.hbm [shape: f32[392,128], index: 1, kind: input, shape index: {}]   ;;  %s634_s2 = inlined_call_operand.vmem [shape: f32[8,128], index: 2, kind: output, shape index: {}]  }
   0x1   :  { %s15_s10 = sshll.u32 %s563_s9, 4  ;;  %s539_s13 = scalar_lea.hbm %s633_s1, 6272  ;;  %s16_s10 = int_to_ptr.vmem [resolvable:$true] %s15_s10 }
   0x2   :  { %p540_p0 = scmp.ne.s32.totalorder %s633_s1, %s539_s13  ;;  %p543_p1 = scmp.lt.u32.totalorder %s539_s13, %s633_s1 }
   0x4   :  { %p545_p2 = pnand %p543_p1, %p540_p0 }
   0x6   :  { %548 = shalt.err (!%p545_p2)
}
   0x7   :  { %s549_s18 = scalar_lea.vmem %s16_s10, 6272  ;;  %p554_p4 = scmp.lt.s32.totalorder %s16_s10, %s16_s10 }
   0x8   :  { %p550_p3 = scmp.ne.s32.totalorder %s16_s10, %s549_s18  ;;  %p555_p5 = scmp.lt.s32.totalorder %s549_s18, %s549_s18 }
   0xa   :  { %p556_p6 = por %p555_p5, %p554_p4 }
   0xc   :  { %p557_p7 = pnand %p556_p6, %p550_p3 }
   0xe   :  { %560 = shalt.err (!%p557_p7)
}
   0xf   :  { %s564_s19 = smov 128   ;;  %s565_s20 = smov 8  }
  0x10   :  { %21 = dma.hbm_to_vmem [thread:$0]  %s633_s1, 6272, %s16_s10, [#allocation3], %s564_s19, %s564_s19, %s565_s20  }
  0x11   :  { %561 = dma.done.wait [#allocation3], 6272  }
  0x12   :  { %562 = vsyncadd [#allocation3], 4294961024  ;;  %v566_v0 = vmov 0.0|0.0   ;;  %vm567_vm0 = vmmov 0   ;;  %v568_v1 = vmov 0.0   ;;  %v26_v2 = vld [vmem:[#allocation2] sm:$0xff] }
  0x13   :  { %461 = vmatprep.subr.bf16.mxu0 %v566_v0  ;;  %388 = vmatprep.mubr.msk.f32.mxu0 %vm567_vm0, %v568_v1  ;;  %v27_v3 = vld [vmem:[#allocation2 + $0x8] sm:$0xff]  ;;  %v28_v4 = vld [vmem:[#allocation2 + $0x10] sm:$0xff]  ;;  %v29_v6 = vld [vmem:[#allocation2 + $0x18] sm:$0xff] }
  0x14   :  { %485 = vmatprep.subr.bf16.mxu1 %v566_v0  ;;  %423 = vmatprep.mubr.msk.f32.mxu1 %vm567_vm0, %v568_v1  ;;  %v462_v5 = vpack.c.bf16 %v27_v3, %v26_v2  ;;  %v465_v7 = vpack.c.bf16 %v29_v6, %v28_v4  ;;  %v30_v8 = vld [vmem:[#allocation2 + $0x20] sm:$0xff]  ;;  %v31_v9 = vld [vmem:[#allocation2 + $0x28] sm:$0xff]  ;;  %v44_v12 = vld [vmem:[#allocation2 + $0x90] sm:$0xff] }
  0x15   :  { %v42_v10 = vld [vmem:[#allocation2 + $0x80] sm:$0xff]  ;;  %v43_v11 = vld [vmem:[#allocation2 + $0x88] sm:$0xff]  ;;  %v45_v13 = vld [vmem:[#allocation2 + $0x98] sm:$0xff]  ;;  %v468_v14 = vpack.c.bf16 %v31_v9, %v30_v8  ;;  %v75_v9 = vlaneseq }
  0x16   :  { %463 = vmatpush3.bf16.msra.mxu0 %v462_v5  ;;  %v486_v15 = vpack.c.bf16 %v43_v11, %v42_v10  ;;  %v32_v16 = vld [vmem:[#allocation2 + $0x30] sm:$0xff]  ;;  %v33_v17 = vld [vmem:[#allocation2 + $0x38] sm:$0xff]  ;;  %v489_v18 = vpack.c.bf16 %v45_v13, %v44_v12  ;;  %v46_v19 = vld [vmem:[#allocation2 + $0xa0] sm:$0xff] }
  0x17   :  { %464 = vmatprep.subr.bf16.mxu0 %v566_v0  ;;  %v47_v20 = vld [vmem:[#allocation2 + $0xa8] sm:$0xff]  ;;  %v471_v21 = vpack.c.bf16 %v33_v17, %v32_v16  ;;  %v34_v22 = vld [vmem:[#allocation2 + $0x40] sm:$0xff]  ;;  %v48_v25 = vld [vmem:[#allocation2 + $0xb0] sm:$0xff]  ;;  %v76_v10 = vshrl.u32 %v75_v9, 7 }
  0x18   :  { %487 = vmatpush3.bf16.msra.mxu1 %v486_v15  ;;  %v35_v23 = vld [vmem:[#allocation2 + $0x48] sm:$0xff]  ;;  %v492_v24 = vpack.c.bf16 %v47_v20, %v46_v19  ;;  %v49_v26 = vld [vmem:[#allocation2 + $0xb8] sm:$0xff]  ;;  %v36_v28 = vld [vmem:[#allocation2 + $0x50] sm:$0xff] }
  0x19   :  { %488 = vmatprep.subr.bf16.mxu1 %v566_v0  ;;  %v474_v27 = vpack.c.bf16 %v35_v23, %v34_v22  ;;  %v37_v29 = vld [vmem:[#allocation2 + $0x58] sm:$0xff]  ;;  %v495_v30 = vpack.c.bf16 %v49_v26, %v48_v25  ;;  %v50_v31 = vld [vmem:[#allocation2 + $0xc0] sm:$0xff]  ;;  %v51_v32 = vld [vmem:[#allocation2 + $0xc8] sm:$0xff]  ;;  %v77_v11 = vsub.s32 0, %v76_v10  ;;  %v227_v26 = vsub.s32 2, %v76_v10 }
  0x1a   :  { %466 = vmatpush3.bf16.msra.mxu0 %v465_v7  ;;  %v477_v33 = vpack.c.bf16 %v37_v29, %v36_v28  ;;  %v38_v34 = vld [vmem:[#allocation2 + $0x60] sm:$0xff]  ;;  %v39_v35 = vld [vmem:[#allocation2 + $0x68] sm:$0xff]  ;;  %v498_v36 = vpack.c.bf16 %v51_v32, %v50_v31  ;;  %v52_v37 = vld [vmem:[#allocation2 + $0xd0] sm:$0xff] }
  0x1b   :  { %467 = vmatprep.subr.bf16.mxu0 %v566_v0  ;;  %v53_v38 = vld [vmem:[#allocation2 + $0xd8] sm:$0xff]  ;;  %v480_v39 = vpack.c.bf16 %v39_v35, %v38_v34  ;;  %v40_v40 = vld [vmem:[#allocation2 + $0x70] sm:$0xff]  ;;  %v54_v43 = vld [vmem:[#allocation2 + $0xe0] sm:$0xff] }
  0x1c   :  { %490 = vmatpush3.bf16.msra.mxu1 %v489_v18  ;;  %v41_v41 = vld [vmem:[#allocation2 + $0x78] sm:$0xff]  ;;  %v501_v42 = vpack.c.bf16 %v53_v38, %v52_v37  ;;  %v55_v44 = vld [vmem:[#allocation2 + $0xe8] sm:$0xff]  ;;  %v25_v47 = vld [vmem:[%s632_s0] sm:$0xff] }
  0x1d   :  { %491 = vmatprep.subr.bf16.mxu1 %v566_v0  ;;  %v483_v45 = vpack.c.bf16 %v41_v41, %v40_v40  ;;  %v504_v46 = vpack.c.bf16 %v55_v44, %v54_v43  ;;  %v56_v48 = vld [vmem:[#allocation2 + $0xf0] sm:$0xff]  ;;  %v57_v49 = vld [vmem:[#allocation2 + $0xf8] sm:$0xff]  ;;  %v58_v51 = vld [vmem:[#allocation2 + $0x100] sm:$0xff] }
  0x1e   :  { %469 = vmatpush3.bf16.msra.mxu0 %v468_v14  ;;  %v507_v50 = vpack.c.bf16 %v57_v49, %v56_v48  ;;  %v59_v52 = vld [vmem:[#allocation2 + $0x108] sm:$0xff]  ;;  %v60_v53 = vld [vmem:[#allocation2 + $0x110] sm:$0xff]  ;;  %v61_v55 = vld [vmem:[#allocation2 + $0x118] sm:$0xff] }
  0x1f   :  { %470 = vmatprep.subr.bf16.mxu0 %v566_v0  ;;  %v510_v54 = vpack.c.bf16 %v59_v52, %v58_v51  ;;  %v513_v56 = vpack.c.bf16 %v61_v55, %v60_v53  ;;  %v62_v57 = vld [vmem:[#allocation2 + $0x120] sm:$0xff]  ;;  %v63_v58 = vld [vmem:[#allocation2 + $0x128] sm:$0xff]  ;;  %v64_v60 = vld [vmem:[#allocation2 + $0x130] sm:$0xff] }
  0x20   :  { %493 = vmatpush3.bf16.msra.mxu1 %v492_v24  ;;  %v516_v59 = vpack.c.bf16 %v63_v58, %v62_v57  ;;  %v65_v61 = vld [vmem:[#allocation2 + $0x138] sm:$0xff]  ;;  %v66_v63 = vld [vmem:[#allocation2 + $0x140] sm:$0xff]  ;;  %v68_v3 = vld [vmem:[#allocation2 + $0x150] sm:$0xff] }
  0x21   :  { %494 = vmatprep.subr.bf16.mxu1 %v566_v0  ;;  %v519_v62 = vpack.c.bf16 %v65_v61, %v64_v60  ;;  %v69_v4 = vld [vmem:[#allocation2 + $0x158] sm:$0xff]  ;;  %v70_v6 = vld [vmem:[#allocation2 + $0x160] sm:$0xff]  ;;  %v71_v7 = vld [vmem:[#allocation2 + $0x168] sm:$0xff] }
  0x22   :  { %472 = vmatpush3.bf16.msra.mxu0 %v471_v21  ;;  %v525_v5 = vpack.c.bf16 %v69_v4, %v68_v3  ;;  %v528_v8 = vpack.c.bf16 %v71_v7, %v70_v6  ;;  %v74_v12 = vld [vmem:[#allocation2 + $0x180] sm:$0xff]  ;;  %v72_v18 = vld [vmem:[#allocation2 + $0x170] sm:$0xff]  ;;  %v73_v19 = vld [vmem:[#allocation2 + $0x178] sm:$0xff]  ;;  %v152_v21 = vsub.s32 1, %v76_v10 }
  0x23   :  { %473 = vmatprep.subr.bf16.mxu0 %v566_v0  ;;  %v78_v13 = vrot.slane %v74_v12, %v77_v11  ;;  %v531_v20 = vpack.c.bf16 %v73_v19, %v72_v18 }
  0x24   :  { %496 = vmatpush3.bf16.msra.mxu1 %v495_v30  ;;  %v153_v22 = vrot.slane %v74_v12, %v152_v21 }
  0x25   :  { %497 = vmatprep.subr.bf16.mxu1 %v566_v0 }
  0x26   :  { %475 = vmatpush3.bf16.msra.mxu0 %v474_v27  ;;  %v228_v27 = vrot.slane %v74_v12, %v227_v26 }
  0x27   :  { %476 = vmatprep.subr.bf16.mxu0 %v566_v0 }
  0x28   :  { %499 = vmatpush3.bf16.msra.mxu1 %v498_v36 }
  0x29   :  { %500 = vmatprep.subr.bf16.mxu1 %v566_v0 }
  0x2a   :  { %478 = vmatpush3.bf16.msra.mxu0 %v477_v33 }
  0x2b   :  { %479 = vmatprep.subr.bf16.mxu0 %v566_v0 }
  0x2c   :  { %502 = vmatpush3.bf16.msra.mxu1 %v501_v42 }
  0x2d   :  { %503 = vmatprep.subr.bf16.mxu1 %v566_v0 }
  0x2e   :  { %481 = vmatpush3.bf16.msra.mxu0 %v480_v39 }
  0x2f   :  { %482 = vmatprep.subr.bf16.mxu0 %v566_v0 }
  0x30   :  { %505 = vmatpush3.bf16.msra.mxu1 %v504_v46 }
  0x31   :  { %506 = vmatprep.subr.bf16.mxu1 %v566_v0 }
  0x32   :  { %484 = vmatpush3.bf16.msra.mxu0 %v483_v45 }
  0x33   :  { %509 = vmatprep.subr.bf16.mxu0 %v566_v0 }
  0x34   :  { %508 = vmatpush3.bf16.msra.mxu1 %v507_v50 }
  0x35   :  { %389 = vmatmul.mubr.f32.vlgmr.msra.gmra.mrb[0].mxu0 %v25_v47 }
  0x36   :  { %458 = vmatprep.mubr.msk.f32.mxu0 %vm567_vm0, %v568_v1  ;;  %511 = vmatpush3.bf16.msra.mxu0 %v510_v54  ;;  %v67_v1 = vld [vmem:[#allocation2 + $0x148] sm:$0xff] }
  0x37   :  { %512 = vmatprep.subr.bf16.mxu0 %v566_v0  ;;  %v522_v2 = vpack.c.bf16 %v67_v1, %v66_v63 }
  0x3a   :  { %514 = vmatpush3.bf16.msra.mxu0 %v513_v56 }
  0x3b   :  { %515 = vmatprep.subr.bf16.mxu0 %v566_v0 }
  0x3e   :  { %517 = vmatpush3.bf16.msra.mxu0 %v516_v59 }
  0x3f   :  { %518 = vmatprep.subr.bf16.mxu0 %v566_v0 }
  0x42   :  { %520 = vmatpush3.bf16.msra.mxu0 %v519_v62 }
  0x43   :  { %521 = vmatprep.subr.bf16.mxu0 %v566_v0 }
  0x46   :  { %523 = vmatpush3.bf16.msra.mxu0 %v522_v2 }
  0x47   :  { %524 = vmatprep.subr.bf16.mxu0 %v566_v0 }
  0x4a   :  { %526 = vmatpush3.bf16.msra.mxu0 %v525_v5 }
  0x4b   :  { %527 = vmatprep.subr.bf16.mxu0 %v566_v0 }
  0x4e   :  { %529 = vmatpush3.bf16.msra.mxu0 %v528_v8 }
  0x4f   :  { %530 = vmatprep.subr.bf16.mxu0 %v566_v0 }
  0x52   :  { %532 = vmatpush3.bf16.msra.mxu0 %v531_v20 }
 0x108   :  { %v145_v14 = vpop.f32.mrb[0].mxu0 }
 0x109   :  { %v146_v15 = vadd.f32 %v145_v14, %v78_v13  ;;  %v390_v16 = vpop.f32.mrb[1].mxu0 }
 0x10b   :  { %v149_v17 = vmax.f32 %v146_v15, 0.0 }
 0x10d   :  { %424 = vmatmul.mubr.f32.vlgmr.msra.gmra.mrb[0].mxu1 %v149_v17 }
 0x1e0   :  { %v220_v23 = vpop.f32.mrb[0].mxu1 }
 0x1e1   :  { %v221_v24 = vadd.f32 %v220_v23, %v153_v22  ;;  %v425_v25 = vpop.f32.mrb[1].mxu1 }
 0x1e3   :  { %v224_v0 = vmax.f32 %v221_v24, 0.0 }
 0x1e5   :  { %459 = vmatmul.mubr.f32.vlgmr.msra.gmra.mrb[2].mxu0 %v224_v0 }
 0x2b8   :  { %v295_v28 = vpop.f32.mrb[2].mxu0 }
 0x2b9   :  { %v296_v29 = vadd.f32 %v295_v28, %v228_v27  ;;  %v460_v30 = vpop.f32.mrb[3].mxu0 }
 0x2bb   :  { %299 = vst [vmem:[%s634_s2] sm:$0xff] %v296_v29 }
 0x2bc   :  { %304 = vsyncpa [#allocation3], 1 }

</bundles_post_ra>
